<compile_context>
chip_gen: v7x
topology: tpu7x:2x2x1
jax: 0.10.0
libtpu: 0.0.40
codegen_flags: <defaults>
</compile_context>

<pallas_src>
import jax
import jax.numpy as jnp
import numpy as np
from jax.experimental import pallas as pl
from jax.experimental.pallas import tpu as pltpu


def _bahdanau_kernel(feat_ref, hid_ref, waT_ref, uaT_ref, va_ref, bias_ref,
                     ctx_ref, attw_ref):
    x = feat_ref[...]                                  # (Bb, L, F)
    Bb, L, F = x.shape
    A = waT_ref.shape[1]

    # atten_1 = W_a(features): one (Bb*L, F) @ (F, A) MXU matmul for the block.
    a1 = jnp.dot(x.reshape(Bb * L, F), waT_ref[...],
                 preferred_element_type=jnp.float32).reshape(Bb, L, A)

    # atten_2 = U_a(hidden): one (Bb, H) @ (H, A) matmul; bw+bu folded in once.
    h = hid_ref[...].reshape(Bb, -1)                   # (Bb, H)
    a2 = jnp.dot(h, uaT_ref[...],
                 preferred_element_type=jnp.float32) + bias_ref[...]   # (Bb, A)

    t = jnp.tanh(a1 + a2[:, None, :])                  # (Bb, L, A), EUP tanh

    # atten_score = v_a(t), keeping L lane-dense:
    # (Bb, 1, A) x (Bb, L, A) contracting A -> (Bb, 1, L).
    # b_v omitted: constant shift of every score, softmax-invariant.
    va_b = jnp.broadcast_to(va_ref[...].reshape(1, 1, A), (Bb, 1, A))
    s = jnp.einsum('bxa,bla->bxl', va_b, t,
                   preferred_element_type=jnp.float32)  # (Bb, 1, L)

    # Numerically stable softmax along the (lane) L axis.
    m = jnp.max(s, axis=-1, keepdims=True)             # (Bb, 1, 1)
    p = jnp.exp(s - m)                                 # (Bb, 1, L)
    w = p / jnp.sum(p, axis=-1, keepdims=True)         # (Bb, 1, L)

    # context = sum_L w * features == batched (1, L) @ (L, F) on the MXU.
    ctx_ref[...] = jnp.einsum('bxl,blf->bxf', w, x,
                              preferred_element_type=jnp.float32)  # (Bb, 1, F)
    attw_ref[...] = w                                              # (Bb, 1, L)


def bahdanau_attention(features, decoder_hidden, params, *, block_b=None):
    """features: (B, L, F); decoder_hidden: (B, H).

    params (PyTorch Linear layout):
      wa (A, F), bw (A,), ua (A, H), bu (A,), va (1, A), bv (1,)
    Returns (context (B, F), atten_weight (B, L)).
    """
    B, L, F = features.shape
    _, H = decoder_hidden.shape
    A = params["wa"].shape[0]
    f32 = jnp.float32

    # Batch several batch elements per grid step: amortize per-step overhead
    # and raise the W_a matmul M (= block_b * L) toward >=128 MXU rows.
    if block_b is None:
        block_b = max(1, min(B, pl.cdiv(128, L), 8))
    grid_b = pl.cdiv(B, block_b)
    b_pad = grid_b * block_b

    feats = features.astype(f32)
    hid = decoder_hidden.astype(f32).reshape(B, 1, H)
    if b_pad != B:
        feats = jnp.pad(feats, ((0, b_pad - B), (0, 0), (0, 0)))
        hid = jnp.pad(hid, ((0, b_pad - B), (0, 0), (0, 0)))

    # Transpose PyTorch (out, in) weights once on the host so kernel GEMMs are
    # plain row-major (M, K) @ (K, N).
    waT = params["wa"].astype(f32).T                   # (F, A)
    uaT = params["ua"].astype(f32).T                   # (H, A)
    va = params["va"].astype(f32).reshape(1, A)        # (1, A)
    bias = (params["bw"] + params["bu"]).astype(f32).reshape(1, A)
    # b_v intentionally not passed: softmax(v.t + b_v) == softmax(v.t).

    ctx, attw = pl.pallas_call(
        _bahdanau_kernel,
        out_shape=(jax.ShapeDtypeStruct((b_pad, 1, F), f32),
                   jax.ShapeDtypeStruct((b_pad, 1, L), f32)),
        grid_spec=pltpu.PrefetchScalarGridSpec(
            num_scalar_prefetch=0,
            grid=(grid_b,),
            in_specs=[
                pl.BlockSpec((block_b, L, F), lambda b: (b, 0, 0)),  # features
                pl.BlockSpec((block_b, 1, H), lambda b: (b, 0, 0)),  # hidden
                pl.BlockSpec((F, A), lambda b: (0, 0)),              # W_a^T (resident)
                pl.BlockSpec((H, A), lambda b: (0, 0)),              # U_a^T (resident)
                pl.BlockSpec((1, A), lambda b: (0, 0)),              # v_a row
                pl.BlockSpec((1, A), lambda b: (0, 0)),              # bw + bu
            ],
            out_specs=[
                pl.BlockSpec((block_b, 1, F), lambda b: (b, 0, 0)),  # context
                pl.BlockSpec((block_b, 1, L), lambda b: (b, 0, 0)),  # attn weights
            ],
        ),
        compiler_params=pltpu.CompilerParams(
            dimension_semantics=("parallel",)),
    )(feats, hid, waT, uaT, va, bias)

    return ctx.reshape(b_pad, F)[:B], attw.reshape(b_pad, L)[:B]


def ref_forward(features, decoder_hidden, params):
    """Pure-JAX reference matching the PyTorch module (including b_v)."""
    a1 = features @ params["wa"].T + params["bw"]                 # (B, L, A)
    a2 = decoder_hidden @ params["ua"].T + params["bu"]           # (B, A)
    t = jnp.tanh(a1 + a2[:, None, :])
    s = t @ params["va"].T + params["bv"]                         # (B, L, 1)
    w = jax.nn.softmax(s, axis=1)
    ctx = jnp.sum(w * features, axis=1)                           # (B, F)
    return ctx, w[..., 0]


def init_params(key, num_features, hidden_dim, attention_dim, output_dim=1):
    """PyTorch nn.Linear default init: U(-1/sqrt(fan_in), 1/sqrt(fan_in))."""
    ks = jax.random.split(key, 6)

    def linear(kw, kb, fan_in, fan_out):
        bound = 1.0 / np.sqrt(fan_in)
        w = jax.random.uniform(kw, (fan_out, fan_in), jnp.float32, -bound, bound)
        b = jax.random.uniform(kb, (fan_out,), jnp.float32, -bound, bound)
        return w, b

    wa, bw = linear(ks[0], ks[1], num_features, attention_dim)
    ua, bu = linear(ks[2], ks[3], hidden_dim, attention_dim)
    va, bv = linear(ks[4], ks[5], attention_dim, output_dim)
    return dict(wa=wa, bw=bw, ua=ua, bu=bu, va=va, bv=bv)


if __name__ == "__main__":
    key = jax.random.PRNGKey(0)
    kp, kf, kh = jax.random.split(key, 3)

    B, L = 2, 64                 # batch, number of spatial features (e.g. 8x8)
    NUM_FEATURES = 256
    HIDDEN_DIM = 128
    ATTENTION_DIM = 128

    params = init_params(kp, NUM_FEATURES, HIDDEN_DIM, ATTENTION_DIM)
    features = jax.random.normal(kf, (B, L, NUM_FEATURES), jnp.float32)
    decoder_hidden = jax.random.normal(kh, (B, HIDDEN_DIM), jnp.float32)

    context, atten_weight = bahdanau_attention(features, decoder_hidden, params)
    context = jax.block_until_ready(context)
    atten_weight = jax.block_until_ready(atten_weight)

    assert context.shape == (B, NUM_FEATURES), context.shape
    assert atten_weight.shape == (B, L), atten_weight.shape

    ref_ctx, ref_w = ref_forward(features, decoder_hidden, params)
    err_ctx = float(jnp.max(jnp.abs(context - ref_ctx)))
    err_w = float(jnp.max(jnp.abs(atten_weight - ref_w)))
    sums = jnp.sum(atten_weight, axis=1)
    assert err_ctx < 1e-3, err_ctx
    assert err_w < 1e-5, err_w
    assert float(jnp.max(jnp.abs(sums - 1.0))) < 1e-5, sums

    print("KERNEL_OK")
</pallas_src>

<mosaic_0001>
module attributes {stable_mosaic.version = 11 : i64} {
  func.func @_bahdanau_kernel(%arg0: i32, %arg1: memref<2x64x256xf32, #tpu.memory_space<vmem>>, %arg2: memref<2x1x128xf32, #tpu.memory_space<vmem>>, %arg3: memref<256x128xf32, #tpu.memory_space<vmem>>, %arg4: memref<128x128xf32, #tpu.memory_space<vmem>>, %arg5: memref<1x128xf32, #tpu.memory_space<vmem>>, %arg6: memref<1x128xf32, #tpu.memory_space<vmem>>, %arg7: memref<2x1x256xf32, #tpu.memory_space<vmem>>, %arg8: memref<2x1x64xf32, #tpu.memory_space<vmem>>) attributes {dimension_semantics = [#tpu.dimension_semantics<parallel>], iteration_bounds = array<i64: 1>, scalar_prefetch = 0 : i64, scratch_operands = 0 : i64, tpu.core_type = #tpu.core_type<tc>, window_params = [{transform_indices = @transform_0, window_bounds = array<i64: 2, 64, 256>}, {transform_indices = @transform_1, window_bounds = array<i64: 2, 1, 128>}, {pipeline_mode = #tpu.pipeline_mode<synchronous>, transform_indices = @transform_2, window_bounds = array<i64: 256, 128>}, {pipeline_mode = #tpu.pipeline_mode<synchronous>, transform_indices = @transform_3, window_bounds = array<i64: 128, 128>}, {pipeline_mode = #tpu.pipeline_mode<synchronous>, transform_indices = @transform_4, window_bounds = array<i64: 1, 128>}, {pipeline_mode = #tpu.pipeline_mode<synchronous>, transform_indices = @transform_5, window_bounds = array<i64: 1, 128>}, {transform_indices = @transform_6, window_bounds = array<i64: 2, 1, 256>}, {transform_indices = @transform_7, window_bounds = array<i64: 2, 1, 64>}]} {
    %c0 = arith.constant 0 : index
    %c0_0 = arith.constant 0 : index
    %c0_1 = arith.constant 0 : index
    %0 = vector.load %arg1[%c0, %c0_0, %c0_1] : memref<2x64x256xf32, #tpu.memory_space<vmem>>, vector<2x64x256xf32>
    %1 = vector.shape_cast %0 : vector<2x64x256xf32> to vector<128x256xf32>
    %c0_2 = arith.constant 0 : index
    %c0_3 = arith.constant 0 : index
    %2 = vector.load %arg3[%c0_2, %c0_3] : memref<256x128xf32, #tpu.memory_space<vmem>>, vector<256x128xf32>
    %cst = arith.constant dense<0.000000e+00> : vector<128x128xf32>
    %3 = tpu.matmul %1, %2, %cst {dimension_numbers = #tpu.dot_dimension_numbers<[1], [0], [0], [1], [0, 0, 1, 1], [], []>} : vector<128x256xf32>, vector<256x128xf32>, vector<128x128xf32> -> vector<128x128xf32>
    %4 = vector.shape_cast %3 : vector<128x128xf32> to vector<2x64x128xf32>
    %c0_4 = arith.constant 0 : index
    %c0_5 = arith.constant 0 : index
    %c0_6 = arith.constant 0 : index
    %5 = vector.load %arg2[%c0_4, %c0_5, %c0_6] : memref<2x1x128xf32, #tpu.memory_space<vmem>>, vector<2x1x128xf32>
    %6 = vector.shape_cast %5 : vector<2x1x128xf32> to vector<2x128xf32>
    %c0_7 = arith.constant 0 : index
    %c0_8 = arith.constant 0 : index
    %7 = vector.load %arg4[%c0_7, %c0_8] : memref<128x128xf32, #tpu.memory_space<vmem>>, vector<128x128xf32>
    %cst_9 = arith.constant dense<0.000000e+00> : vector<2x128xf32>
    %8 = tpu.matmul %6, %7, %cst_9 {dimension_numbers = #tpu.dot_dimension_numbers<[1], [0], [0], [1], [0, 0, 1, 1], [], []>} : vector<2x128xf32>, vector<128x128xf32>, vector<2x128xf32> -> vector<2x128xf32>
    %c0_10 = arith.constant 0 : index
    %c0_11 = arith.constant 0 : index
    %9 = vector.load %arg6[%c0_10, %c0_11] : memref<1x128xf32, #tpu.memory_space<vmem>>, vector<1x128xf32>
    %10 = vector.broadcast %9 : vector<1x128xf32> to vector<2x128xf32>
    %11 = arith.addf %8, %10 : vector<2x128xf32>
    %12 = vector.shape_cast %11 : vector<2x128xf32> to vector<2x1x128xf32>
    %13 = vector.broadcast %12 : vector<2x1x128xf32> to vector<2x64x128xf32>
    %14 = arith.addf %4, %13 : vector<2x64x128xf32>
    %15 = math.tanh %14 : vector<2x64x128xf32>
    %c0_12 = arith.constant 0 : index
    %c0_13 = arith.constant 0 : index
    %16 = vector.load %arg5[%c0_12, %c0_13] : memref<1x128xf32, #tpu.memory_space<vmem>>, vector<1x128xf32>
    %17 = vector.shape_cast %16 : vector<1x128xf32> to vector<1x1x128xf32>
    %18 = vector.shape_cast %17 : vector<1x1x128xf32> to vector<1x1x128xf32>
    %19 = vector.broadcast %18 : vector<1x1x128xf32> to vector<2x1x128xf32>
    "tpu.trace_start"() <{level = 10 : i32, message = "bxa,bla->bxl"}> : () -> ()
    %cst_14 = arith.constant dense<0.000000e+00> : vector<2x1x64xf32>
    %20 = tpu.matmul %19, %15, %cst_14 {dimension_numbers = #tpu.dot_dimension_numbers<[2], [2], [1], [1], [0, 0, 0, 1, 1, 1], [0], [0]>} : vector<2x1x128xf32>, vector<2x64x128xf32>, vector<2x1x64xf32> -> vector<2x1x64xf32>
    "tpu.trace_stop"() : () -> ()
    %cst_15 = arith.constant dense<0xFF800000> : vector<2x1xf32>
    %21 = vector.multi_reduction <maximumf>, %20, %cst_15 [2] : vector<2x1x64xf32> to vector<2x1xf32>
    %22 = vector.shape_cast %21 : vector<2x1xf32> to vector<2x1x1xf32>
    %23 = vector.broadcast %22 : vector<2x1x1xf32> to vector<2x1x64xf32>
    %24 = arith.subf %20, %23 : vector<2x1x64xf32>
    %25 = math.exp %24 : vector<2x1x64xf32>
    %cst_16 = arith.constant dense<0.000000e+00> : vector<2x1xf32>
    %26 = vector.multi_reduction <add>, %25, %cst_16 [2] : vector<2x1x64xf32> to vector<2x1xf32>
    %27 = vector.shape_cast %26 : vector<2x1xf32> to vector<2x1x1xf32>
    %28 = vector.broadcast %27 : vector<2x1x1xf32> to vector<2x1x64xf32>
    %29 = arith.divf %25, %28 : vector<2x1x64xf32>
    "tpu.trace_start"() <{level = 10 : i32, message = "bxl,blf->bxf"}> : () -> ()
    %cst_17 = arith.constant dense<0.000000e+00> : vector<2x1x256xf32>
    %30 = tpu.matmul %29, %0, %cst_17 {dimension_numbers = #tpu.dot_dimension_numbers<[2], [1], [1], [2], [0, 0, 0, 1, 1, 2], [0], [0]>} : vector<2x1x64xf32>, vector<2x64x256xf32>, vector<2x1x256xf32> -> vector<2x1x256xf32>
    "tpu.trace_stop"() : () -> ()
    %c0_18 = arith.constant 0 : index
    %c0_19 = arith.constant 0 : index
    %c0_20 = arith.constant 0 : index
    %31 = vector.load %arg7[%c0_18, %c0_19, %c0_20] : memref<2x1x256xf32, #tpu.memory_space<vmem>>, vector<2x1x256xf32>
    tpu.vector_store %arg7[%c0_18, %c0_19, %c0_20], %30 {strides = array<i32>} : memref<2x1x256xf32, #tpu.memory_space<vmem>>, vector<2x1x256xf32>,
    %c0_21 = arith.constant 0 : index
    %c0_22 = arith.constant 0 : index
    %c0_23 = arith.constant 0 : index
    %32 = vector.load %arg8[%c0_21, %c0_22, %c0_23] : memref<2x1x64xf32, #tpu.memory_space<vmem>>, vector<2x1x64xf32>
    tpu.vector_store %arg8[%c0_21, %c0_22, %c0_23], %29 {strides = array<i32>} : memref<2x1x64xf32, #tpu.memory_space<vmem>>, vector<2x1x64xf32>,
    return
  }
  func.func @transform_0(%arg0: i32) -> (i32, i32, i32) {
    %c0_i32 = arith.constant 0 : i32
    %c0_i32_0 = arith.constant 0 : i32
    %c0_i32_1 = arith.constant 0 : i32
    return %arg0, %c0_i32, %c0_i32_0 : i32, i32, i32
  }
  func.func @transform_1(%arg0: i32) -> (i32, i32, i32) {
    %c0_i32 = arith.constant 0 : i32
    %c0_i32_0 = arith.constant 0 : i32
    %c0_i32_1 = arith.constant 0 : i32
    return %arg0, %c0_i32, %c0_i32_0 : i32, i32, i32
  }
  func.func @transform_2(%arg0: i32) -> (i32, i32) {
    %c0_i32 = arith.constant 0 : i32
    %c0_i32_0 = arith.constant 0 : i32
    %c0_i32_1 = arith.constant 0 : i32
    return %c0_i32, %c0_i32_0 : i32, i32
  }
  func.func @transform_3(%arg0: i32) -> (i32, i32) {
    %c0_i32 = arith.constant 0 : i32
    %c0_i32_0 = arith.constant 0 : i32
    %c0_i32_1 = arith.constant 0 : i32
    return %c0_i32, %c0_i32_0 : i32, i32
  }
  func.func @transform_4(%arg0: i32) -> (i32, i32) {
    %c0_i32 = arith.constant 0 : i32
    %c0_i32_0 = arith.constant 0 : i32
    %c0_i32_1 = arith.constant 0 : i32
    return %c0_i32, %c0_i32_0 : i32, i32
  }
  func.func @transform_5(%arg0: i32) -> (i32, i32) {
    %c0_i32 = arith.constant 0 : i32
    %c0_i32_0 = arith.constant 0 : i32
    %c0_i32_1 = arith.constant 0 : i32
    return %c0_i32, %c0_i32_0 : i32, i32
  }
  func.func @transform_6(%arg0: i32) -> (i32, i32, i32) {
    %c0_i32 = arith.constant 0 : i32
    %c0_i32_0 = arith.constant 0 : i32
    %c0_i32_1 = arith.constant 0 : i32
    return %arg0, %c0_i32, %c0_i32_0 : i32, i32, i32
  }
  func.func @transform_7(%arg0: i32) -> (i32, i32, i32) {
    %c0_i32 = arith.constant 0 : i32
    %c0_i32_0 = arith.constant 0 : i32
    %c0_i32_1 = arith.constant 0 : i32
    return %arg0, %c0_i32, %c0_i32_0 : i32, i32, i32
  }
}

</mosaic_0001>

<bundles_post_ra>
// kernel: tpu_custom_call.1
= control target key start
LH: loop header
LB: loop body
LE: loop exit
PB: predicated region body
PF: predicated region fallthrough
CT: control target
= control target key end

     0   :  { %13 = vsyncpa [#allocation3], 0  ;;  %s1713_s0 = inlined_call_operand.hbm [shape: f32[2,64,256], index: 0, kind: input, shape index: {}]   ;;  %s1714_s1 = inlined_call_operand.vmem [shape: f32[2,1,128], index: 1, kind: input, shape index: {}]   ;;  %s1715_s2 = inlined_call_operand.hbm [shape: f32[256,128], index: 2, kind: input, shape index: {}]   ;;  %s1716_s3 = inlined_call_operand.hbm [shape: f32[128,128], index: 3, kind: input, shape index: {}]   ;;  %s1717_s4 = inlined_call_operand.vmem [shape: f32[1,128], index: 4, kind: input, shape index: {}]   ;;  %s1718_s5 = inlined_call_operand.vmem [shape: f32[1,128], index: 5, kind: input, shape index: {}]   ;;  %s1719_s6 = inlined_call_operand.hbm [shape: f32[2,1,256], index: 6, kind: output, shape index: {0}]   ;;  %s1720_s7 = inlined_call_operand.hbm [shape: f32[2,1,64], index: 7, kind: output, shape index: {1}]  }
   0x1   :  { %14 = vsyncpa [#allocation6], 0 }
   0x2   :  { %15 = vsyncpa [#allocation4], 0 }
   0x3   :  { %16 = vsyncpa [#allocation10], 0  ;;  %s1323_s24 = smov [#allocation5]   ;;  %s1205_s28 = scalar_lea.hbm %s1715_s2, 4096 }
   0x4   :  { %s36_s25 = sshll.u32 %s1323_s24, 4  ;;  %p1206_p0 = scmp.ne.s32.totalorder %s1715_s2, %s1205_s28  ;;  %s37_s25 = int_to_ptr.vmem [resolvable:$true] %s36_s25 }
   0x5   :  { %p1209_p1 = scmp.lt.u32.totalorder %s1205_s28, %s1715_s2 }
   0x7   :  { %p1211_p2 = pnand %p1209_p1, %p1206_p0 }
   0x9   :  { %1214 = shalt.err (!%p1211_p2)
}
   0xa   :  { %s1215_s10 = scalar_lea.vmem %s37_s25, 4096  ;;  %p1220_p4 = scmp.lt.s32.totalorder %s37_s25, %s37_s25 }
   0xb   :  { %p1216_p3 = scmp.ne.s32.totalorder %s37_s25, %s1215_s10  ;;  %p1221_p5 = scmp.lt.s32.totalorder %s1215_s10, %s1215_s10 }
   0xd   :  { %p1222_p6 = por %p1221_p5, %p1220_p4 }
   0xf   :  { %p1223_p7 = pnand %p1222_p6, %p1216_p3 }
  0x11   :  { %1226 = shalt.err (!%p1223_p7)
}
  0x12   :  { %s1324_s11 = smov 128   ;;  %s1325_s12 = smov 8  }
  0x13   :  { %42 = dma.hbm_to_vmem [thread:$0]  %s1715_s2, 4096, %s37_s25, [#allocation6], %s1324_s11, %s1324_s11, %s1325_s12  }
  0x14   :  { %s1326_s15 = smov [#allocation2]   ;;  %s1227_s19 = scalar_lea.hbm %s1713_s0, 4096 }
  0x15   :  { %s22_s16 = sshll.u32 %s1326_s15, 4  ;;  %p1228_p8 = scmp.ne.s32.totalorder %s1713_s0, %s1227_s19  ;;  %s23_s16 = int_to_ptr.vmem [resolvable:$true] %s22_s16 }
  0x16   :  { %p1231_p9 = scmp.lt.u32.totalorder %s1227_s19, %s1713_s0 }
  0x18   :  { %p1233_p10 = pnand %p1231_p9, %p1228_p8 }
  0x1a   :  { %1236 = shalt.err (!%p1233_p10)
}
  0x1b   :  { %s1237_s24 = scalar_lea.vmem %s23_s16, 4096  ;;  %p1242_p12 = scmp.lt.s32.totalorder %s23_s16, %s23_s16 }
  0x1c   :  { %p1238_p11 = scmp.ne.s32.totalorder %s23_s16, %s1237_s24  ;;  %p1243_p13 = scmp.lt.s32.totalorder %s1237_s24, %s1237_s24 }
  0x1e   :  { %p1244_p0 = por %p1243_p13, %p1242_p12 }
  0x20   :  { %p1245_p1 = pnand %p1244_p0, %p1238_p11 }
  0x22   :  { %1248 = shalt.err (!%p1245_p1)
}
  0x23   :  { %s1327_s2 = smov 256   ;;  %s1328_s25 = smov 16  }
  0x24   :  { %28 = dma.hbm_to_vmem [thread:$0]  %s1713_s0, 4096, %s23_s16, [#allocation3], %s1327_s2, %s1327_s2, %s1328_s25  }
  0x25   :  { %s1329_s28 = smov [#allocation7]   ;;  %s1249_s9 = scalar_lea.hbm %s1716_s3, 2048 }
  0x26   :  { %s48_s29 = sshll.u32 %s1329_s28, 4  ;;  %p1250_p2 = scmp.ne.s32.totalorder %s1716_s3, %s1249_s9  ;;  %s49_s29 = int_to_ptr.vmem [resolvable:$true] %s48_s29 }
  0x27   :  { %p1253_p3 = scmp.lt.u32.totalorder %s1249_s9, %s1716_s3 }
  0x29   :  { %p1255_p4 = pnand %p1253_p3, %p1250_p2 }
  0x2b   :  { %1258 = shalt.err (!%p1255_p4)
}
  0x2c   :  { %s1259_s17 = scalar_lea.vmem %s49_s29, 2048  ;;  %p1264_p6 = scmp.lt.s32.totalorder %s49_s29, %s49_s29 }
  0x2d   :  { %p1260_p5 = scmp.ne.s32.totalorder %s49_s29, %s1259_s17  ;;  %p1265_p7 = scmp.lt.s32.totalorder %s1259_s17, %s1259_s17 }
  0x2f   :  { %p1266_p8 = por %p1265_p7, %p1264_p6 }
  0x31   :  { %p1267_p9 = pnand %p1266_p8, %p1260_p5 }
  0x33   :  { %1270 = shalt.err (!%p1267_p9)
}
  0x34   :  { %54 = dma.hbm_to_vmem [thread:$0]  %s1716_s3, 2048, %s49_s29, [#allocation6], %s1324_s11, %s1324_s11, %s1325_s12  }
  0x35   :  { %1315 = dma.done.wait [#allocation3], 4096  }
  0x36   :  { %1316 = vsyncadd [#allocation3], 4294963200 }
  0x37   :  { %1317 = dma.done.wait [#allocation6], 6144  }
  0x38   :  { %1318 = vsyncadd [#allocation6], 4294961152  ;;  %v1330_v0 = vmov 0.0|0.0   ;;  %vm1331_vm0 = vmmov 0   ;;  %v1332_v1 = vmov 0.0   ;;  %v116_v2 = vld [vmem:[#allocation5 + $0x80] sm:$0xff]  ;;  %v1721_v53 = vlaneseq }
  0x39   :  { %1069 = vmatprep.subr.bf16.mxu1 %v1330_v0  ;;  %996 = vmatprep.mubr.msk.f32.mxu1 %vm1331_vm0, %v1332_v1  ;;  %v117_v3 = vld [vmem:[#allocation5 + $0x88] sm:$0xff]  ;;  %v279_v4 = vld [vmem:[#allocation7] sm:$0xff]  ;;  %v118_v11 = vld [vmem:[#allocation5 + $0x90] sm:$0xff]  ;;  %v1333_v51 = vmov 1966171168   ;;  %vm596_vm1 = vcmask 516096  }
  0x3a   :  { %v1037_v5 = vpack.c.bf16 %v117_v3, %v116_v2  ;;  %v280_v6 = vld [vmem:[#allocation7 + $0x8] sm:$0xff]  ;;  %v100_v7 = vld [vmem:[#allocation5] sm:$0xff]  ;;  %v119_v12 = vld [vmem:[#allocation5 + $0x98] sm:$0xff]  ;;  %v306_v52 = vunpack.c.l.s4 %v1333_v51  ;;  %vm619_vm2 = vcmask 523264  }
  0x3b   :  { %v101_v8 = vld [vmem:[#allocation5 + $0x8] sm:$0xff]  ;;  %v1070_v9 = vpack.c.bf16 %v280_v6, %v279_v4  ;;  %v281_v13 = vld [vmem:[#allocation7 + $0x10] sm:$0xff]  ;;  %v1041_v14 = vpack.c.bf16 %v119_v12, %v118_v11  ;;  %v282_v15 = vld [vmem:[#allocation7 + $0x18] sm:$0xff] }
  0x3c   :  { %v1039_v10 = vpack.c.bf16 %v101_v8, %v100_v7  ;;  %1038 = vmatprep.subr.bf16.mxu0 %v1037_v5  ;;  %v102_v16 = vld [vmem:[#allocation5 + $0x10] sm:$0xff]  ;;  %v103_v17 = vld [vmem:[#allocation5 + $0x18] sm:$0xff]  ;;  %v1073_v18 = vpack.c.bf16 %v282_v15, %v281_v13  ;;  %v120_v20 = vld [vmem:[#allocation5 + $0xa0] sm:$0xff]  ;;  %v307_v12 = vunpack.c.0.s8 %v306_v52  ;;  %v1471_v13 = vshrl.u32 %v1721_v53, 7 }
  0x3d   :  { %1071 = vmatpush3.bf16.msra.mxu1 %v1070_v9  ;;  %v1043_v19 = vpack.c.bf16 %v103_v17, %v102_v16  ;;  %v121_v21 = vld [vmem:[#allocation5 + $0xa8] sm:$0xff]  ;;  %v283_v22 = vld [vmem:[#allocation7 + $0x20] sm:$0xff]  ;;  %v122_v27 = vld [vmem:[#allocation5 + $0xb0] sm:$0xff] }
  0x3e   :  { %1040 = vmatpush3.bf16.msra.mxu0 %v1039_v10  ;;  %1072 = vmatprep.subr.bf16.mxu1 %v1330_v0  ;;  %v1045_v23 = vpack.c.bf16 %v121_v21, %v120_v20  ;;  %v284_v24 = vld [vmem:[#allocation7 + $0x28] sm:$0xff]  ;;  %v104_v25 = vld [vmem:[#allocation5 + $0x20] sm:$0xff]  ;;  %v123_v28 = vld [vmem:[#allocation5 + $0xb8] sm:$0xff] }
  0x3f   :  { %1042 = vmatprep.subr.bf16.mxu0 %v1041_v14  ;;  %v105_v26 = vld [vmem:[#allocation5 + $0x28] sm:$0xff]  ;;  %v1076_v29 = vpack.c.bf16 %v284_v24, %v283_v22  ;;  %v285_v31 = vld [vmem:[#allocation7 + $0x30] sm:$0xff]  ;;  %v1049_v32 = vpack.c.bf16 %v123_v28, %v122_v27  ;;  %v286_v33 = vld [vmem:[#allocation7 + $0x38] sm:$0xff] }
  0x40   :  { %v1047_v30 = vpack.c.bf16 %v105_v26, %v104_v25  ;;  %v106_v34 = vld [vmem:[#allocation5 + $0x30] sm:$0xff]  ;;  %v107_v35 = vld [vmem:[#allocation5 + $0x38] sm:$0xff]  ;;  %v124_v36 = vld [vmem:[#allocation5 + $0xc0] sm:$0xff]  ;;  %v1079_v38 = vpack.c.bf16 %v286_v33, %v285_v31 }
  0x41   :  { %1074 = vmatpush3.bf16.msra.mxu1 %v1073_v18  ;;  %v125_v37 = vld [vmem:[#allocation5 + $0xc8] sm:$0xff]  ;;  %v1051_v39 = vpack.c.bf16 %v107_v35, %v106_v34  ;;  %v287_v40 = vld [vmem:[#allocation7 + $0x40] sm:$0xff]  ;;  %v126_v45 = vld [vmem:[#allocation5 + $0xd0] sm:$0xff] }
  0x42   :  { %1044 = vmatpush3.bf16.msra.mxu0 %v1043_v19  ;;  %1075 = vmatprep.subr.bf16.mxu1 %v1330_v0  ;;  %v1053_v41 = vpack.c.bf16 %v125_v37, %v124_v36  ;;  %v288_v42 = vld [vmem:[#allocation7 + $0x48] sm:$0xff]  ;;  %v108_v43 = vld [vmem:[#allocation5 + $0x40] sm:$0xff]  ;;  %v127_v46 = vld [vmem:[#allocation5 + $0xd8] sm:$0xff] }
  0x43   :  { %1046 = vmatprep.subr.bf16.mxu0 %v1045_v23  ;;  %v109_v44 = vld [vmem:[#allocation5 + $0x48] sm:$0xff]  ;;  %v1428_v47 = vld [vmem:[#allocation7 + $0x50] sm:$0xff]  ;;  %v1430_v48 = vld [vmem:[#allocation7 + $0x58] sm:$0xff]  ;;  %v1082_v54 = vpack.c.bf16 %v288_v42, %v287_v40  ;;  %v1057_v59 = vpack.c.bf16 %v127_v46, %v126_v45  ;;  %v1519_v42 = vsub.s32 %v307_v12, %v1471_v13 }
  0x44   :  { %v1432_v49 = vld [vmem:[#allocation5 + $0x50] sm:$0xff]  ;;  %v1434_v50 = vld [vmem:[#allocation5 + $0x58] sm:$0xff]  ;;  %v1055_v55 = vpack.c.bf16 %v109_v44, %v108_v43  ;;  %v1436_v56 = vld [vmem:[#allocation5 + $0xe0] sm:$0xff]  ;;  %v1085_v18 = vpack.c.bf16 %v1430_v48, %v1428_v47 }
  0x45   :  { %1077 = vmatpush3.bf16.msra.mxu1 %v1076_v29  ;;  %v1438_v57 = vld [vmem:[#allocation2 + $0x8] sm:$0xff]  ;;  %v1440_v58 = vld [vmem:[#allocation2 + $0x18] sm:$0xff]  ;;  %v1447_v62 = vld [vmem:[#allocation2] sm:$0xff]  ;;  %v1059_v19 = vpack.c.bf16 %v1434_v50, %v1432_v49 }
  0x46   :  { %1048 = vmatpush3.bf16.msra.mxu0 %v1047_v30  ;;  %1078 = vmatprep.subr.bf16.mxu1 %v1330_v0  ;;  %v1443_v60 = vld [vmem:[#allocation5 + $0xe8] sm:$0xff]  ;;  %v1117_v61 = vpack.c.bf16 %v1440_v58, %v1438_v57  ;;  %v1449_v63 = vld [vmem:[#allocation2 + $0x10] sm:$0xff]  ;;  %v1455_v2 = vld [vmem:[%s1714_s1] sm:$0x1] }
  0x47   :  { %1050 = vmatprep.subr.bf16.mxu0 %v1049_v32  ;;  %196 = vmatprep.mubr.f32.mxu0 %v1438_v57  ;;  %v1460_v3 = vld [vmem:[%s1714_s1 + $0x1] sm:$0x1]  ;;  %v1119_v4 = vpack.c.bf16 %v1449_v63, %v1447_v62  ;;  %v1464_v5 = vld [vmem:[#allocation2 + $0x28] sm:$0xff]  ;;  %v1468_v7 = vld [vmem:[#allocation2 + $0x38] sm:$0xff]  ;;  %v1061_v26 = vpack.c.bf16 %v1443_v60, %v1436_v56 }
  0x48   :  { %v1466_v6 = vld [vmem:[#allocation2 + $0x20] sm:$0xff]  ;;  %v292_v9 = vld [vmem:[#allocation7 + $0x68] sm:$0xff]  ;;  %v1121_v14 = vpack.c.bf16 %v1468_v7, %v1464_v5  ;;  %v1475_v15 = vld [vmem:[#allocation2 + $0x30] sm:$0xff] }
  0x49   :  { %1080 = vmatpush3.bf16.msra.mxu1 %v1079_v38  ;;  %v291_v8 = vld [vmem:[#allocation7 + $0x60] sm:$0xff]  ;;  %v113_v11 = vld [vmem:[#allocation5 + $0x68] sm:$0xff]  ;;  %v130_v20 = vld [vmem:[#allocation5 + $0xf0] sm:$0xff]  ;;  %v1123_v22 = vpack.c.bf16 %v1475_v15, %v1466_v6 }
  0x4a   :  { %1052 = vmatpush3.bf16.msra.mxu0 %v1051_v39  ;;  %1081 = vmatprep.subr.bf16.mxu1 %v1330_v0  ;;  %v112_v10 = vld [vmem:[#allocation5 + $0x60] sm:$0xff]  ;;  %v1477_v16 = vld [vmem:[#allocation2 + $0x48] sm:$0xff]  ;;  %v131_v21 = vld [vmem:[#allocation5 + $0xf8] sm:$0xff]  ;;  %v1088_v47 = vpack.c.bf16 %v292_v9, %v291_v8 }
  0x4b   :  { %1054 = vmatprep.subr.bf16.mxu0 %v1053_v41  ;;  %v1479_v17 = vld [vmem:[#allocation2 + $0x40] sm:$0xff]  ;;  %v1487_v23 = vld [vmem:[#allocation2 + $0x58] sm:$0xff]  ;;  %v1489_v24 = vld [vmem:[#allocation2 + $0x50] sm:$0xff]  ;;  %v304_v41 = vcombine.low %v1455_v2, %v1460_v3  ;;  %v1063_v48 = vpack.c.bf16 %v113_v11, %v112_v10 }
  0x4c   :  { %v1491_v25 = vld [vmem:[#allocation2 + $0x68] sm:$0xff]  ;;  %v1125_v27 = vpack.c.bf16 %v1487_v23, %v1477_v16  ;;  %v1127_v28 = vpack.c.bf16 %v1489_v24, %v1479_v17  ;;  %v1500_v29 = vld [vmem:[#allocation2 + $0x60] sm:$0xff]  ;;  %v1502_v30 = vld [vmem:[#allocation2 + $0x78] sm:$0xff] }
  0x4d   :  { %1083 = vmatpush3.bf16.msra.mxu1 %v1082_v54  ;;  %v1504_v31 = vld [vmem:[#allocation2 + $0x70] sm:$0xff]  ;;  %v1510_v34 = vld [vmem:[#allocation2 + $0x88] sm:$0xff]  ;;  %v1512_v35 = vld [vmem:[#allocation2 + $0x80] sm:$0xff]  ;;  %v1065_v54 = vpack.c.bf16 %v131_v21, %v130_v20  ;;  %v311_v9 = vrot.slane %v304_v41, %v1519_v42 }
  0x4e   :  { %1056 = vmatpush3.bf16.msra.mxu0 %v1055_v55  ;;  %1084 = vmatprep.subr.bf16.mxu1 %v1330_v0  ;;  %v1514_v36 = vld [vmem:[#allocation2 + $0x98] sm:$0xff]  ;;  %v293_v37 = vld [vmem:[#allocation7 + $0x70] sm:$0xff]  ;;  %v1525_v45 = vld [vmem:[#allocation2 + $0xa8] sm:$0xff] }
  0x4f   :  { %1058 = vmatprep.subr.bf16.mxu0 %v1057_v59  ;;  %v294_v38 = vld [vmem:[#allocation7 + $0x78] sm:$0xff]  ;;  %v114_v39 = vld [vmem:[#allocation5 + $0x70] sm:$0xff]  ;;  %v1527_v46 = vld [vmem:[#allocation2 + $0xa0] sm:$0xff]  ;;  %v318_v12 = vrot.slane %v311_v9, %v1519_v42 }
  0x50   :  { %v115_v40 = vld [vmem:[#allocation5 + $0x78] sm:$0xff]  ;;  %v1523_v44 = vld [vmem:[#allocation2 + $0x90] sm:$0xff]  ;;  %v1535_v52 = vld [vmem:[#allocation2 + $0xc8] sm:$0xff]  ;;  %v1091_v10 = vpack.c.bf16 %v294_v38, %v293_v37 }
  0x51   :  { %1086 = vmatpush3.bf16.msra.mxu1 %v1085_v18  ;;  %v1531_v50 = vld [vmem:[#allocation2 + $0xb8] sm:$0xff]  ;;  %v1533_v51 = vld [vmem:[#allocation2 + $0xb0] sm:$0xff]  ;;  %v1542_v59 = vld [vmem:[#allocation2 + $0xc0] sm:$0xff]  ;;  %v1067_v11 = vpack.c.bf16 %v115_v40, %v114_v39 }
  0x52   :  { %1060 = vmatpush3.bf16.msra.mxu0 %v1059_v19  ;;  %1087 = vmatprep.subr.bf16.mxu1 %v1330_v0  ;;  %v1544_v60 = vld [vmem:[#allocation2 + $0xd8] sm:$0xff]  ;;  %v1546_v2 = vld [vmem:[#allocation2 + $0xd0] sm:$0xff]  ;;  %v1585_v18 = vld [vmem:[#allocation2 + $0xe8] sm:$0xff] }
  0x53   :  { %1062 = vmatprep.subr.bf16.mxu0 %v1061_v26  ;;  %v1589_v19 = vld [vmem:[#allocation2 + $0xe0] sm:$0xff]  ;;  %v1591_v20 = vld [vmem:[#allocation2 + $0xf8] sm:$0xff]  ;;  %v1595_v21 = vld [vmem:[#allocation2 + $0xf0] sm:$0xff] }
  0x54   :  { %v846_v26 = vld [vmem:[%s1718_s5] ss:$0 sm:$0xff] }
  0x55   :  { %1089 = vmatpush3.bf16.msra.mxu1 %v1088_v47 }
  0x56   :  { %1064 = vmatpush3.bf16.msra.mxu0 %v1063_v48  ;;  %1090 = vmatprep.subr.bf16.mxu1 %v1330_v0 }
  0x57   :  { %1066 = vmatprep.subr.bf16.mxu0 %v1065_v54  ;;  %v415_v54 = vsub.s32 0, %v1471_v13 }
  0x59   :  { %1092 = vmatpush3.bf16.msra.mxu1 %v1091_v10 }
  0x5a   :  { %1068 = vmatpush3.bf16.msra.mxu0 %v1067_v11  ;;  %1093 = vmatprep.subr.bf16.mxu1 %v1330_v0 }
  0x5b   :  { %1105 = vmatprep.subr.bf16.mxu0 %v1330_v0 }
  0x5c   :  { %997 = vmatmul.mubr.f32.vlgmr.msra.gmra.mrb[0].mxu1 %v318_v12 }
  0x5d   :  { %197 = vmatmul.mubr.f32.vlgmr.msra.gmra.mrb[0].mxu0 %v1447_v62  ;;  %1015 = vmatprep.mubr.msk.f32.mxu1 %vm1331_vm0, %v1332_v1 }
  0x5e   :  { %201 = vmatprep.mubr.f32.mxu0 %v1440_v58 }
  0x61   :  { %202 = vmatmul.mubr.f32.gmra.mrb[2].mxu0 %v1449_v63 }
  0x62   :  { %206 = vmatprep.mubr.f32.mxu0 %v1464_v5 }
  0x65   :  { %207 = vmatmul.mubr.f32.gmra.mrb[4].mxu0 %v1466_v6 }
  0x66   :  { %211 = vmatprep.mubr.f32.mxu0 %v1468_v7 }
  0x69   :  { %212 = vmatmul.mubr.f32.gmra.mrb[6].mxu0 %v1475_v15  ;;  %v1724_v15 = vpack.c.bf16 %v1514_v36, %v1510_v34 }
  0x6a   :  { %216 = vmatprep.mubr.f32.mxu0 %v1477_v16 }
  0x6d   :  { %217 = vmatmul.mubr.f32.gmra.mrb[8].mxu0 %v1479_v17 }
  0x6e   :  { %221 = vmatprep.mubr.f32.mxu0 %v1487_v23 }
  0x71   :  { %222 = vmatmul.mubr.f32.gmra.mrb[10].mxu0 %v1489_v24 }
  0x72   :  { %226 = vmatprep.mubr.f32.mxu0 %v1491_v25 }
  0x75   :  { %227 = vmatmul.mubr.f32.gmra.mrb[12].mxu0 %v1500_v29 }
  0x76   :  { %231 = vmatprep.mubr.f32.mxu0 %v1502_v30 }
  0x79   :  { %232 = vmatmul.mubr.f32.gmra.mrb[14].mxu0 %v1504_v31 }
  0x7a   :  { %236 = vmatprep.mubr.f32.mxu0 %v1510_v34 }
  0x7d   :  { %237 = vmatmul.mubr.f32.gmra.mrb[16].mxu0 %v1512_v35 }
  0x7e   :  { %241 = vmatprep.mubr.f32.mxu0 %v1514_v36 }
  0x81   :  { %242 = vmatmul.mubr.f32.gmra.mrb[18].mxu0 %v1523_v44 }
  0x82   :  { %246 = vmatprep.mubr.f32.mxu0 %v1525_v45 }
  0x85   :  { %247 = vmatmul.mubr.f32.gmra.mrb[20].mxu0 %v1527_v46 }
  0x86   :  { %251 = vmatprep.mubr.f32.mxu0 %v1531_v50 }
  0x89   :  { %252 = vmatmul.mubr.f32.gmra.mrb[22].mxu0 %v1533_v51 }
  0x8a   :  { %256 = vmatprep.mubr.f32.mxu0 %v1535_v52 }
  0x8d   :  { %257 = vmatmul.mubr.f32.gmra.mrb[24].mxu0 %v1542_v59 }
  0x8e   :  { %261 = vmatprep.mubr.f32.mxu0 %v1544_v60 }
  0x91   :  { %262 = vmatmul.mubr.f32.gmra.mrb[26].mxu0 %v1546_v2 }
  0x92   :  { %266 = vmatprep.mubr.f32.mxu0 %v1585_v18 }
  0x95   :  { %267 = vmatmul.mubr.f32.gmra.mrb[28].mxu0 %v1589_v19 }
  0x96   :  { %271 = vmatprep.mubr.f32.mxu0 %v1591_v20 }
  0x99   :  { %272 = vmatmul.mubr.f32.gmra.mrb[30].mxu0 %v1595_v21 }
  0x9a   :  { %1034 = vmatprep.mubr.msk.f32.mxu0 %vm1331_vm0, %v1332_v1 }
 0x12f   :  { %v386_v37 = vpop.f32.mrb[0].mxu1 }
 0x130   :  { %v881_v38 = vpop.f32.mrb[0].mxu0  ;;  %v387_v39 = vadd.f32 %v846_v26, %v386_v37  ;;  %v998_v41 = vpop.f32.mrb[1].mxu1 }
 0x131   :  { %v882_v40 = vpop.f32.mrb[1].mxu0 }
 0x132   :  { %v883_v47 = vadd.f32 %v882_v40, %v881_v38  ;;  %v397_v48 = vrot.slane %v387_v39, %v1519_v42 }
 0x134   :  { %v884_v9 = vpop.f32.mrb[2].mxu0  ;;  %v405_v10 = vrot.slane %v397_v48, %v1519_v42 }
 0x135   :  { %v885_v11 = vpop.f32.mrb[3].mxu0 }
 0x136   :  { %v886_v12 = vadd.f32 %v885_v11, %v884_v9  ;;  %v416_v53 = vrot.slane %v405_v10, %v415_v54 }
 0x138   :  { %v887_v8 = vpop.f32.mrb[4].mxu0  ;;  %v423_v3 = vadd.f32 %v883_v47, %v416_v53  ;;  %v424_v56 = vadd.f32 %v886_v12, %v416_v53 }
 0x139   :  { %v888_v55 = vpop.f32.mrb[5].mxu0 }
 0x13a   :  { %v889_v49 = vadd.f32 %v888_v55, %v887_v8  ;;  %1165 = vtanh.f32 %v423_v3 }
 0x13b   :  { %1167 = vtanh.f32 %v424_v56  ;;  %v398_v56 = vcombine.high %v397_v48, %v397_v48 }
 0x13c   :  { %v425_v26 = vadd.f32 %v889_v49, %v416_v53  ;;  %v890_v37 = vpop.f32.mrb[6].mxu0 }
 0x13d   :  { %v891_v38 = vpop.f32.mrb[7].mxu0 }
 0x13e   :  { %v892_v40 = vadd.f32 %v891_v38, %v890_v37  ;;  %1169 = vtanh.f32 %v425_v26 }
 0x140   :  { %v426_v39 = vadd.f32 %v892_v40, %v416_v53  ;;  %v893_v41 = vpop.f32.mrb[8].mxu0 }
 0x141   :  { %v894_v13 = vpop.f32.mrb[9].mxu0 }
 0x142   :  { %1171 = vtanh.f32 %v426_v39  ;;  %v895_v43 = vadd.f32 %v894_v13, %v893_v41  ;;  %v412_v41 = vrot.slane %v398_v56, %v1519_v42 }
 0x144   :  { %v427_v33 = vadd.f32 %v895_v43, %v416_v53  ;;  %v896_v9 = vpop.f32.mrb[10].mxu0  ;;  %v1166_v10 = vpop.eup %1165 }
 0x145   :  { %v897_v11 = vpop.f32.mrb[11].mxu0  ;;  %v1168_v47 = vpop.eup %1167 }
 0x146   :  { %v898_v12 = vadd.f32 %v897_v11, %v896_v9  ;;  %v1094_v32 = vpack.c.bf16 %v1168_v47, %v1166_v10  ;;  %1173 = vtanh.f32 %v427_v33  ;;  %v1608_v33 = vrot.slane %v412_v41, %v415_v54 }
 0x148   :  { %v428_v55 = vadd.f32 %v898_v12, %v416_v53  ;;  %v899_v3 = vpop.f32.mrb[12].mxu0  ;;  %1095 = vmatpush3.bf16.xpose.msra.mxu1 %v1094_v32  ;;  %v1170_v26 = vpop.eup %1169 }
 0x149   :  { %v900_v49 = vpop.f32.mrb[13].mxu0  ;;  %1096 = vmatprep.subr.bf16.mxu1 %v1330_v0 }
 0x14a   :  { %1175 = vtanh.f32 %v428_v55  ;;  %v901_v8 = vadd.f32 %v900_v49, %v899_v3 }
 0x14c   :  { %v1172_v37 = vpop.eup %1171  ;;  %v429_v38 = vadd.f32 %v901_v8, %v416_v53  ;;  %v902_v43 = vpop.f32.mrb[14].mxu0 }
 0x14d   :  { %v903_v40 = vpop.f32.mrb[15].mxu0  ;;  %v1097_v39 = vpack.c.bf16 %v1172_v37, %v1170_v26 }
 0x14e   :  { %v904_v13 = vadd.f32 %v903_v40, %v902_v43  ;;  %1177 = vtanh.f32 %v429_v38 }
 0x150   :  { %v430_v9 = vadd.f32 %v904_v13, %v416_v53  ;;  %v905_v10 = vpop.f32.mrb[16].mxu0  ;;  %1098 = vmatpush3.bf16.xpose.msra.mxu1 %v1097_v39  ;;  %v1174_v11 = vpop.eup %1173 }
 0x151   :  { %v906_v32 = vpop.f32.mrb[17].mxu0  ;;  %1099 = vmatprep.subr.bf16.mxu1 %v1330_v0 }
 0x152   :  { %1179 = vtanh.f32 %v430_v9  ;;  %v907_v48 = vadd.f32 %v906_v32, %v905_v10 }
 0x154   :  { %v1176_v47 = vpop.eup %1175  ;;  %v431_v12 = vadd.f32 %v907_v48, %v1608_v33  ;;  %v908_v55 = vpop.f32.mrb[18].mxu0 }
 0x155   :  { %v909_v3 = vpop.f32.mrb[19].mxu0  ;;  %v1100_v49 = vpack.c.bf16 %v1176_v47, %v1174_v11 }
 0x156   :  { %v910_v56 = vadd.f32 %v909_v3, %v908_v55  ;;  %1181 = vtanh.f32 %v431_v12 }
 0x158   :  { %v432_v53 = vadd.f32 %v910_v56, %v1608_v33  ;;  %v911_v8 = vpop.f32.mrb[20].mxu0  ;;  %1101 = vmatpush3.bf16.xpose.msra.mxu1 %v1100_v49  ;;  %v1178_v37 = vpop.eup %1177  ;;  %v455_v49 = vld [vmem:[%s1717_s4] sm:$0x1]  ;;  %s1334_s4 = smov [#allocation9]  }
 0x159   :  { %v912_v26 = vpop.f32.mrb[21].mxu0  ;;  %1102 = vmatprep.subr.bf16.mxu1 %v1330_v0  ;;  %s829_s21 = sshll.u32 %s1334_s4, 4  ;;  %s830_s21 = int_to_ptr.vmem [resolvable:$true] %s829_s21 }
 0x15a   :  { %1183 = vtanh.f32 %v432_v53  ;;  %v913_v54 = vadd.f32 %v912_v26, %v911_v8  ;;  %s1271_s22 = scalar_lea.vmem %s830_s21, 32  ;;  %p1276_p11 = scmp.lt.s32.totalorder %s830_s21, %s830_s21 }
 0x15b   :  { %p1272_p10 = scmp.ne.s32.totalorder %s830_s21, %s1271_s22  ;;  %p1277_p12 = scmp.lt.s32.totalorder %s1271_s22, %s1271_s22 }
 0x15c   :  { %v1180_v38 = vpop.eup %1179  ;;  %v433_v43 = vadd.f32 %v913_v54, %v1608_v33  ;;  %v914_v40 = vpop.f32.mrb[22].mxu0 }
 0x15d   :  { %v915_v39 = vpop.f32.mrb[23].mxu0  ;;  %v1103_v41 = vpack.c.bf16 %v1180_v38, %v1178_v37  ;;  %p1278_p13 = por %p1277_p12, %p1276_p11 }
 0x15e   :  { %v916_v13 = vadd.f32 %v915_v39, %v914_v40  ;;  %1185 = vtanh.f32 %v433_v43 }
 0x15f   :  { %p1279_p0 = pnand %p1278_p13, %p1272_p10 }
 0x160   :  { %v434_v9 = vadd.f32 %v916_v13, %v1608_v33  ;;  %v917_v10 = vpop.f32.mrb[24].mxu0  ;;  %1104 = vmatpush3.bf16.xpose.msra.mxu1 %v1103_v41  ;;  %v1182_v11 = vpop.eup %1181 }
 0x161   :  { %v918_v32 = vpop.f32.mrb[25].mxu0  ;;  %1118 = vmatprep.subr.bf16.mxu1 %v1117_v61 }
 0x162   :  { %1187 = vtanh.f32 %v434_v9  ;;  %v919_v48 = vadd.f32 %v918_v32, %v917_v10 }
 0x164   :  { %v1184_v47 = vpop.eup %1183  ;;  %v435_v12 = vadd.f32 %v919_v48, %v1608_v33  ;;  %v920_v55 = vpop.f32.mrb[26].mxu0 }
 0x165   :  { %v921_v3 = vpop.f32.mrb[27].mxu0  ;;  %v1106_v56 = vpack.c.bf16 %v1184_v47, %v1182_v11  ;;  %v1725_v11 = vpack.c.bf16 %v1523_v44, %v1512_v35  ;;  %v1726_v47 = vpack.c.bf16 %v1531_v50, %v1525_v45  ;;  %v1147_v35 = vpack.c.bf16 %v1595_v21, %v1589_v19 }
 0x166   :  { %v922_v53 = vadd.f32 %v921_v3, %v920_v55  ;;  %1189 = vtanh.f32 %v435_v12  ;;  %v1727_v12 = vpack.c.bf16 %v1533_v51, %v1527_v46  ;;  %v1145_v55 = vpack.c.bf16 %v1591_v20, %v1585_v18 }
 0x167   :  { %1107 = vmatpush3.bf16.xpose.msra.mxu0 %v1106_v56  ;;  %1016 = vmatmul.mubr.f32.vlgmr.msra.gmra.mrb[2].mxu1 %v455_v49  ;;  %v1728_v3 = vpack.c.bf16 %v1544_v60, %v1535_v52 }
 0x168   :  { %v436_v8 = vadd.f32 %v922_v53, %v1608_v33  ;;  %v923_v26 = vpop.f32.mrb[28].mxu0  ;;  %1108 = vmatprep.subr.bf16.mxu0 %v1330_v0  ;;  %1120 = vmatpush1.bf16.msra.mxu1 %v1119_v4  ;;  %v1186_v61 = vpop.eup %1185  ;;  %v1722_v4 = vpack.c.bf16 %v1502_v30, %v1491_v25 }
 0x169   :  { %v924_v57 = vpop.f32.mrb[29].mxu0  ;;  %687 = vmatprep.mubr.f32.mxu1 %v1332_v1  ;;  %1122 = vmatprep.subr.bf16.mxu1 %v1121_v14  ;;  %v1723_v14 = vpack.c.bf16 %v1504_v31, %v1500_v29 }
 0x16a   :  { %1191 = vtanh.f32 %v436_v8  ;;  %v925_v58 = vadd.f32 %v924_v57, %v923_v26 }
 0x16c   :  { %v1188_v54 = vpop.eup %1187  ;;  %v437_v37 = vadd.f32 %v925_v58, %v1608_v33  ;;  %v926_v38 = vpop.f32.mrb[30].mxu0  ;;  %1124 = vmatpush1.bf16.msra.mxu1 %v1123_v22 }
 0x16d   :  { %v927_v43 = vpop.f32.mrb[31].mxu0  ;;  %v1109_v40 = vpack.c.bf16 %v1188_v54, %v1186_v61  ;;  %1126 = vmatprep.subr.bf16.mxu1 %v1125_v27 }
 0x16e   :  { %v928_v62 = vadd.f32 %v927_v43, %v926_v38  ;;  %1193 = vtanh.f32 %v437_v37 }
 0x16f   :  { %1110 = vmatpush3.bf16.xpose.msra.mxu0 %v1109_v40 }
 0x170   :  { %v438_v63 = vadd.f32 %v928_v62, %v1608_v33  ;;  %1111 = vmatprep.subr.bf16.mxu0 %v1330_v0  ;;  %1128 = vmatpush1.bf16.msra.mxu1 %v1127_v28  ;;  %v1190_v5 = vpop.eup %1189 }
 0x171   :  { %1130 = vmatprep.subr.bf16.mxu1 %v1722_v4 }
 0x172   :  { %1195 = vtanh.f32 %v438_v63 }
 0x174   :  { %v1192_v6 = vpop.eup %1191  ;;  %1132 = vmatpush1.bf16.msra.mxu1 %v1723_v14 }
 0x175   :  { %v1112_v7 = vpack.c.bf16 %v1192_v6, %v1190_v5  ;;  %1134 = vmatprep.subr.bf16.mxu1 %v1724_v15 }
 0x177   :  { %1113 = vmatpush3.bf16.xpose.msra.mxu0 %v1112_v7 }
 0x178   :  { %1114 = vmatprep.subr.bf16.mxu0 %v1330_v0  ;;  %v1194_v16 = vpop.eup %1193 }
 0x17c   :  { %v1196_v17 = vpop.eup %1195 }
 0x17d   :  { %v1115_v22 = vpack.c.bf16 %v1196_v17, %v1194_v16 }
 0x17f   :  { %1116 = vmatpush3.bf16.xpose.msra.mxu0 %v1115_v22 }
 0x186   :  { %1035 = vmatmul.mubr.f32.vlgmr.msra.gmra.mrb[32].mxu0 %v455_v49 }
 0x23a   :  { %v522_v23 = vpop.f32.mrb[2].mxu1 }
 0x23b   :  { %v597_v24 = vsel %vm596_vm1, %v522_v23, -inf  ;;  %v1017_v25 = vpop.f32.mrb[3].mxu1 }
 0x23c   :  { %598 = vmax.xlane.f32.xlu0 %v597_v24 }
 0x259   :  { %v592_v27 = vpop.f32.mrb[32].mxu0 }
 0x25a   :  { %v600_v28 = vsel %vm596_vm1, %v592_v27, -inf  ;;  %v1036_v29 = vpop.f32.mrb[33].mxu0 }
 0x25b   :  { %601 = vmax.xlane.f32.xlu0 %v600_v28 }
 0x2c9   :  { %v599_v30 = vpop.xlane.xlu0 %598 }
 0x2ca   :  { %v603_v31 = vsub.f32 %v522_v23, %v599_v30 }
 0x2cc   :  { %v605_v34 = vmul.f32 1.442695, %v603_v31 }
 0x2ce   :  { %1197 = vpow2.f32 %v605_v34 }
 0x2d8   :  { %v1198_v0 = vpop.eup %1197 }
 0x2d9   :  { %v609_v36 = vsel %vm596_vm1, %v1198_v0, 0.0 }
 0x2da   :  { %610 = vadd.xlane.f32.xlu1 %v609_v36 }
 0x2e8   :  { %v602_v33 = vpop.xlane.xlu0 %601 }
 0x2e9   :  { %v604_v39 = vsub.f32 %v592_v27, %v602_v33 }
 0x2eb   :  { %v607_v41 = vmul.f32 1.442695, %v604_v39 }
 0x2ed   :  { %1199 = vpow2.f32 %v607_v41 }
 0x2f7   :  { %v1200_v13 = vpop.eup %1199 }
 0x2f8   :  { %v612_v9 = vsel %vm596_vm1, %v1200_v13, 0.0 }
 0x2f9   :  { %613 = vadd.xlane.f32.xlu1 %v612_v9 }
 0x367   :  { %v611_v10 = vpop.xlane.xlu1 %610 }
 0x368   :  { %1201 = vrcp.f32 %v611_v10 }
 0x372   :  { %v1202_v32 = vpop.eup %1201 }
 0x373   :  { %v616_v48 = vmul.f32 %v1202_v32, %v1198_v0 }
 0x375   :  { %810 = vst.msk [vmem:[#allocation9] sm:$0x1] %vm596_vm1, %v616_v48  ;;  %847 = vmatmul.mubr.msk.f32.vlgmr.msra.gmra.mrb[4].mxu1 %vm619_vm2, %v616_v48 }
 0x376   :  { %1136 = vmatpush1.bf16.msra.mxu1 %v1725_v11  ;;  %761 = vmatprep.mubr.f32.mxu1 %v1332_v1  ;;  %v1729_v1 = vpack.c.bf16 %v1546_v2, %v1542_v59 }
 0x377   :  { %1138 = vmatprep.subr.bf16.mxu1 %v1726_v47 }
 0x37a   :  { %1140 = vmatpush1.bf16.msra.mxu1 %v1727_v12 }
 0x37b   :  { %1142 = vmatprep.subr.bf16.mxu1 %v1728_v3 }
 0x37e   :  { %1144 = vmatpush1.bf16.msra.mxu1 %v1729_v1 }
 0x37f   :  { %1146 = vmatprep.subr.bf16.mxu1 %v1145_v55 }
 0x382   :  { %1148 = vmatpush1.bf16.msra.mxu1 %v1147_v35 }
 0x386   :  { %v614_v44 = vpop.xlane.xlu1 %613 }
 0x387   :  { %1203 = vrcp.f32 %v614_v44 }
 0x391   :  { %v1204_v45 = vpop.eup %1203 }
 0x392   :  { %v618_v46 = vmul.f32 %v1204_v45, %v1200_v13 }
 0x394   :  { %811 = vst.msk [vmem:[#allocation9 + $0x1] sm:$0x1] %vm596_vm1, %v618_v46  ;;  %848 = vmatmul.mubr.msk.f32.vlgmr.msra.gmra.mrb[6].mxu1 %vm619_vm2, %v618_v46 }
 0x395   :  { %1282 = shalt.err (!%p1279_p0)
}
 0x396   :  { %s1283_s2 = scalar_lea.hbm %s1720_s7, 32 }
 0x397   :  { %p1284_p1 = scmp.ne.s32.totalorder %s1720_s7, %s1283_s2  ;;  %p1287_p2 = scmp.lt.u32.totalorder %s1283_s2, %s1720_s7 }
 0x399   :  { %p1289_p3 = pnand %p1287_p2, %p1284_p1 }
 0x39b   :  { %1292 = shalt.err (!%p1289_p3)
}
 0x39c   :  { %s1335_s30 = smov 1   ;;  %v1730_v60 = vlaneseq  ;;  %s1336_s10 = smov [#allocation8]  }
 0x39d   :  { %835 = dma.vmem_to_hbm [thread:$0]  %s830_s21, 32, %s1720_s7, [#allocation10], %s1328_s25, %s1328_s25, %s1335_s30  }
 0x39e   :  { %vm806_vm3 = vcmp.lt.s32.totalorder %v1730_v60, 256  ;;  %s817_s13 = sshll.u32 %s1336_s10, 4  ;;  %s818_s13 = int_to_ptr.vmem [resolvable:$true] %s817_s13 }
 0x39f   :  { %s1293_s7 = scalar_lea.vmem %s818_s13, 64  ;;  %p1298_p5 = scmp.lt.s32.totalorder %s818_s13, %s818_s13 }
 0x3a0   :  { %p1294_p4 = scmp.ne.s32.totalorder %s818_s13, %s1293_s7  ;;  %p1299_p6 = scmp.lt.s32.totalorder %s1293_s7, %s1293_s7 }
 0x3a2   :  { %p1300_p7 = por %p1299_p6, %p1298_p5 }
 0x3a4   :  { %p1301_p8 = pnand %p1300_p7, %p1294_p4 }
 0x448   :  { %v689_v50 = vpop.f32.mrb[4].mxu1 }
 0x449   :  { %v691_v51 = vpop.f32.mrb[5].mxu1 }
 0x44a   :  { %v772_v52 = vcombine.low %v689_v50, %v691_v51 }
 0x44c   :  { %v779_v59 = vrot.slane %v772_v52, %v1519_v42 }
 0x44e   :  { %v786_v2 = vrot.slane %v779_v59, %v1519_v42 }
 0x450   :  { %808 = vst.msk [vmem:[#allocation8] sm:$0x3] %vm806_vm3, %v786_v2 }
 0x467   :  { %v763_v18 = vpop.f32.mrb[6].mxu1 }
 0x468   :  { %v765_v19 = vpop.f32.mrb[7].mxu1 }
 0x469   :  { %v787_v20 = vcombine.low %v763_v18, %v765_v19 }
 0x46b   :  { %v794_v21 = vrot.slane %v787_v20, %v1519_v42 }
 0x46d   :  { %v801_v49 = vrot.slane %v794_v21, %v1519_v42 }
 0x46f   :  { %809 = vst.msk [vmem:[#allocation8 + $0x2] sm:$0x3] %vm806_vm3, %v801_v49 }
 0x470   :  { %1304 = shalt.err (!%p1301_p8)
}
 0x471   :  { %s1305_s15 = scalar_lea.hbm %s1719_s6, 64 }
 0x472   :  { %p1306_p9 = scmp.ne.s32.totalorder %s1719_s6, %s1305_s15  ;;  %p1309_p10 = scmp.lt.u32.totalorder %s1305_s15, %s1719_s6 }
 0x474   :  { %p1311_p11 = pnand %p1309_p10, %p1306_p9 }
 0x476   :  { %1314 = shalt.err (!%p1311_p11)
}
 0x477   :  { %s1337_s11 = smov 32   ;;  %s1338_s12 = smov 2  }
 0x478   :  { %823 = dma.vmem_to_hbm [thread:$0]  %s818_s13, 64, %s1719_s6, [#allocation4], %s1337_s11, %s1337_s11, %s1338_s12  }
 0x479   :  { %1319 = dma.done.wait [#allocation4], 64  }
 0x47a   :  { %1320 = vsyncadd [#allocation4], 4294967232 }
 0x47b   :  { %1321 = dma.done.wait [#allocation10], 32  }
 0x47c   :  { %1322 = vsyncadd [#allocation10], 4294967264 }
 0x47d   :  { %842 = vsyncpa [#allocation3], 1 }
 0x47e   :  { %843 = vsyncpa [#allocation6], 1 }
 0x47f   :  { %844 = vsyncpa [#allocation4], 1 }
 0x480   :  { %845 = vsyncpa [#allocation10], 1 }

</bundles_post_ra>
